<compile_context>
chip_gen: v7x
topology: tpu7x:2x2x1
jax: 0.10.0
libtpu: 0.0.40
codegen_flags: <defaults>
</compile_context>

<pallas_src>
import numpy as np
import jax
import jax.numpy as jnp
from jax.experimental import pallas as pl
from jax.experimental.pallas import tpu as pltpu


SCALES = (1, 2, 3, 6)
SS_PAD = 64          # padded pooled-spatial length (>= 6*6), shared by all branches


# ------------------------------------------------------------------ kernel ----
def _pyramid_kernel(x_ref, wall_ref, bsc_ref, bbi_ref, poolT_ref, upT_ref,
                    wox_ref, wob_ref, osc_ref, obi_ref, o_ref):
    """Whole PyramidPooling forward for one batch element, fully VMEM resident."""
    x = x_ref[0]                                                   # (C, HW)

    # All four branch 1x1 convs + folded BN (affine only) in one matmul, hoisted
    # in front of the pooling.  ReLU is applied after pooling (see loop below).
    y = jnp.dot(wall_ref[...], x, preferred_element_type=jnp.float32)
    y = y * bsc_ref[...] + bbi_ref[...]                            # (4*inter, HW)

    # Final 1x1 conv accumulated chunk-by-chunk (implicit concat): x-chunk first.
    acc = jnp.dot(wox_ref[...], x, preferred_element_type=jnp.float32)   # (Cout, HW)

    n_branch = poolT_ref.shape[0]
    inter = wall_ref.shape[0] // n_branch
    for b in range(n_branch):                                      # static unroll
        yb = y[b * inter:(b + 1) * inter, :]                       # (inter, HW)
        pooled = jnp.dot(yb, poolT_ref[b],
                         preferred_element_type=jnp.float32)       # (inter, SS_PAD)
        pooled = jnp.maximum(pooled, 0.0)                          # ReLU (post-pool)
        up = jnp.dot(pooled, upT_ref[b],
                     preferred_element_type=jnp.float32)           # (inter, HW)
        acc = acc + jnp.dot(wob_ref[b], up,
                            preferred_element_type=jnp.float32)    # (Cout, HW)

    out = acc * osc_ref[...] + obi_ref[...]                        # folded BN (out)
    o_ref[0] = jnp.maximum(out, 0.0).astype(o_ref.dtype)


# --------------------------------------------------------------- wrapper ------
def pyramid_pooling_forward(x, kin):
    N, C, H, W = x.shape
    HW = H * W
    out_c = kin['wo_x'].shape[0]
    x2 = x.reshape(N, C, HW)                        # free (contiguous) reshape

    def full(a):
        return pl.BlockSpec(a.shape, lambda n, _nd=a.ndim: (0,) * _nd)

    y = pl.pallas_call(
        _pyramid_kernel,
        out_shape=jax.ShapeDtypeStruct((N, out_c, HW), jnp.float32),
        grid=(N,),
        in_specs=[pl.BlockSpec((1, C, HW), lambda n: (n, 0, 0)),
                  full(kin['wall']), full(kin['bscale']), full(kin['bbias']),
                  full(kin['poolT']), full(kin['upT']),
                  full(kin['wo_x']), full(kin['wo_b']),
                  full(kin['oscale']), full(kin['obias'])],
        out_specs=pl.BlockSpec((1, out_c, HW), lambda n: (n, 0, 0)),
        compiler_params=pltpu.CompilerParams(
            dimension_semantics=("parallel",)),
    )(x2, kin['wall'], kin['bscale'], kin['bbias'], kin['poolT'], kin['upT'],
      kin['wo_x'], kin['wo_b'], kin['oscale'], kin['obias'])
    return y.reshape(N, out_c, H, W)                # free reshape back to NCHW


# --------------------------------------------------- interpolation matrices ---
def adaptive_pool_matrix(out_size, in_size):
    """PyTorch AdaptiveAvgPool1d weights: P[o, start:end] = 1/(end-start)."""
    P = np.zeros((out_size, in_size), dtype=np.float32)
    for o in range(out_size):
        start = (o * in_size) // out_size
        end = -((-(o + 1) * in_size) // out_size)   # ceil((o+1)*in/out)
        P[o, start:end] = 1.0 / (end - start)
    return P


def bilinear_matrix(out_size, in_size):
    """F.interpolate(mode='bilinear', align_corners=True) weights, 1-D."""
    U = np.zeros((out_size, in_size), dtype=np.float32)
    if in_size == 1:
        U[:, 0] = 1.0
        return U
    if out_size == 1:
        U[0, 0] = 1.0
        return U
    scale = (in_size - 1) / (out_size - 1)
    for o in range(out_size):
        pos = o * scale
        i0 = int(np.floor(pos))
        i1 = min(i0 + 1, in_size - 1)
        frac = pos - i0
        U[o, i0] += 1.0 - frac
        U[o, i1] += frac
    return U


# ----------------------------------------------------------------- params -----
def init_params(key, in_channels, out_channels):
    inter = in_channels // 4
    eps = 1e-5
    params = {}
    keys = jax.random.split(key, 25)
    ki = 0

    def conv_bn(name, cin, cout):
        nonlocal ki
        w = 0.1 * jax.random.normal(keys[ki], (cout, cin), jnp.float32); ki += 1
        gamma = 1.0 + 0.1 * jax.random.normal(keys[ki], (cout,), jnp.float32); ki += 1
        beta = 0.1 * jax.random.normal(keys[ki], (cout,), jnp.float32); ki += 1
        mean = 0.1 * jax.random.normal(keys[ki], (cout,), jnp.float32); ki += 1
        var = jnp.abs(jax.random.normal(keys[ki], (cout,), jnp.float32)) + 0.5; ki += 1
        scale = gamma / jnp.sqrt(var + eps)
        bias = beta - mean * scale
        params[f'{name}_w'] = w            # 1x1 conv weight as (Cout, Cin)
        params[f'{name}_scale'] = scale    # folded BN scale (eval mode)
        params[f'{name}_bias'] = bias      # folded BN bias  (eval mode)

    for i in range(4):
        conv_bn(f'conv{i + 1}', in_channels, inter)
    conv_bn('out', 2 * in_channels, out_channels)
    return params


def prepare_pyramid_inputs(params, H, W):
    """Pack params + precomputed pool/upsample Kronecker matrices for the kernel."""
    HW = H * W
    inter, C = params['conv1_w'].shape

    wall = jnp.concatenate([params[f'conv{i + 1}_w'] for i in range(4)], axis=0)
    bscale = jnp.concatenate([params[f'conv{i + 1}_scale'] for i in range(4)])[:, None]
    bbias = jnp.concatenate([params[f'conv{i + 1}_bias'] for i in range(4)])[:, None]

    poolT = np.zeros((len(SCALES), HW, SS_PAD), np.float32)
    upT = np.zeros((len(SCALES), SS_PAD, HW), np.float32)
    for bi, s in enumerate(SCALES):
        Ph = adaptive_pool_matrix(s, H)     # (s, H)
        Pw = adaptive_pool_matrix(s, W)     # (s, W)
        Uh = bilinear_matrix(H, s)          # (H, s)
        Uw = bilinear_matrix(W, s)          # (W, s)
        poolT[bi, :, :s * s] = np.kron(Ph, Pw).T    # (HW, s*s)  zero-padded
        upT[bi, :s * s, :] = np.kron(Uh, Uw).T      # (s*s, HW)  zero-padded

    w_out = params['out_w']                 # (out_c, 2C), channel order [x, f1..f4]
    wo_x = w_out[:, :C]
    wo_b = jnp.stack([w_out[:, C + b * inter: C + (b + 1) * inter]
                      for b in range(4)], axis=0)   # (4, out_c, inter)

    return dict(wall=wall, bscale=bscale, bbias=bbias,
                poolT=jnp.asarray(poolT), upT=jnp.asarray(upT),
                wo_x=wo_x, wo_b=wo_b,
                oscale=params['out_scale'][:, None],
                obias=params['out_bias'][:, None])


# ------------------------------------------------------- pure-JAX reference ---
def _forward_ref(x, params, H, W):
    """Original op ordering: pool -> conv -> BN -> ReLU -> upsample -> cat -> conv."""
    feats = [x]
    for idx, s in enumerate(SCALES):
        Ph = jnp.asarray(adaptive_pool_matrix(s, H))
        Pw = jnp.asarray(adaptive_pool_matrix(s, W))
        Uh = jnp.asarray(bilinear_matrix(H, s))
        Uw = jnp.asarray(bilinear_matrix(W, s))
        pooled = jnp.einsum('ih,jw,nchw->ncij', Ph, Pw, x)
        y = jnp.einsum('ncij,dc->ndij', pooled, params[f'conv{idx + 1}_w'])
        y = y * params[f'conv{idx + 1}_scale'][None, :, None, None] \
            + params[f'conv{idx + 1}_bias'][None, :, None, None]
        y = jnp.maximum(y, 0.0)
        feats.append(jnp.einsum('hi,wj,ncij->nchw', Uh, Uw, y))
    cat = jnp.concatenate(feats, axis=1)
    y = jnp.einsum('nchw,dc->ndhw', cat, params['out_w'])
    y = y * params['out_scale'][None, :, None, None] \
        + params['out_bias'][None, :, None, None]
    return jnp.maximum(y, 0.0)


if __name__ == "__main__":
    key = jax.random.PRNGKey(0)
    kx, kp = jax.random.split(key)
    N, C, H, W = 2, 16, 16, 16        # in_channels=16 -> inter_channels=4
    out_channels = 16
    x = jax.random.normal(kx, (N, C, H, W), jnp.float32)
    params = init_params(kp, C, out_channels)
    kin = prepare_pyramid_inputs(params, H, W)

    out = jax.block_until_ready(pyramid_pooling_forward(x, kin))
    assert out.shape == (N, out_channels, H, W), out.shape

    ref = jax.block_until_ready(_forward_ref(x, params, H, W))
    np.testing.assert_allclose(np.asarray(out), np.asarray(ref), rtol=1e-4, atol=1e-4)

    print("KERNEL_OK")
</pallas_src>

<mosaic_0001>
module attributes {stable_mosaic.version = 11 : i64} {
  func.func @_pyramid_kernel(%arg0: i32, %arg1: memref<1x16x256xf32, #tpu.memory_space<vmem>>, %arg2: memref<16x16xf32, #tpu.memory_space<vmem>>, %arg3: memref<16x1xf32, #tpu.memory_space<vmem>>, %arg4: memref<16x1xf32, #tpu.memory_space<vmem>>, %arg5: memref<4x256x64xf32, #tpu.memory_space<vmem>>, %arg6: memref<4x64x256xf32, #tpu.memory_space<vmem>>, %arg7: memref<16x16xf32, #tpu.memory_space<vmem>>, %arg8: memref<4x16x4xf32, #tpu.memory_space<vmem>>, %arg9: memref<16x1xf32, #tpu.memory_space<vmem>>, %arg10: memref<16x1xf32, #tpu.memory_space<vmem>>, %arg11: memref<1x16x256xf32, #tpu.memory_space<vmem>>) attributes {dimension_semantics = [#tpu.dimension_semantics<parallel>], iteration_bounds = array<i64: 2>, scalar_prefetch = 0 : i64, scratch_operands = 0 : i64, tpu.core_type = #tpu.core_type<tc>, window_params = [{transform_indices = @transform_0, window_bounds = array<i64: 1, 16, 256>}, {pipeline_mode = #tpu.pipeline_mode<synchronous>, transform_indices = @transform_1, window_bounds = array<i64: 16, 16>}, {pipeline_mode = #tpu.pipeline_mode<synchronous>, transform_indices = @transform_2, window_bounds = array<i64: 16, 1>}, {pipeline_mode = #tpu.pipeline_mode<synchronous>, transform_indices = @transform_3, window_bounds = array<i64: 16, 1>}, {pipeline_mode = #tpu.pipeline_mode<synchronous>, transform_indices = @transform_4, window_bounds = array<i64: 4, 256, 64>}, {pipeline_mode = #tpu.pipeline_mode<synchronous>, transform_indices = @transform_5, window_bounds = array<i64: 4, 64, 256>}, {pipeline_mode = #tpu.pipeline_mode<synchronous>, transform_indices = @transform_6, window_bounds = array<i64: 16, 16>}, {pipeline_mode = #tpu.pipeline_mode<synchronous>, transform_indices = @transform_7, window_bounds = array<i64: 4, 16, 4>}, {pipeline_mode = #tpu.pipeline_mode<synchronous>, transform_indices = @transform_8, window_bounds = array<i64: 16, 1>}, {pipeline_mode = #tpu.pipeline_mode<synchronous>, transform_indices = @transform_9, window_bounds = array<i64: 16, 1>}, {transform_indices = @transform_10, window_bounds = array<i64: 1, 16, 256>}]} {
    %c0 = arith.constant 0 : index
    %c0_0 = arith.constant 0 : index
    %c0_1 = arith.constant 0 : index
    %0 = vector.load %arg1[%c0, %c0_0, %c0_1] : memref<1x16x256xf32, #tpu.memory_space<vmem>>, vector<1x16x256xf32>
    %1 = vector.shape_cast %0 : vector<1x16x256xf32> to vector<16x256xf32>
    %c0_2 = arith.constant 0 : index
    %c0_3 = arith.constant 0 : index
    %2 = vector.load %arg2[%c0_2, %c0_3] : memref<16x16xf32, #tpu.memory_space<vmem>>, vector<16x16xf32>
    %cst = arith.constant dense<0.000000e+00> : vector<16x256xf32>
    %3 = tpu.matmul %2, %1, %cst {dimension_numbers = #tpu.dot_dimension_numbers<[1], [0], [0], [1], [0, 0, 1, 1], [], []>} : vector<16x16xf32>, vector<16x256xf32>, vector<16x256xf32> -> vector<16x256xf32>
    %c0_4 = arith.constant 0 : index
    %c0_5 = arith.constant 0 : index
    %4 = vector.load %arg3[%c0_4, %c0_5] : memref<16x1xf32, #tpu.memory_space<vmem>>, vector<16x1xf32>
    %5 = vector.broadcast %4 : vector<16x1xf32> to vector<16x256xf32>
    %6 = arith.mulf %3, %5 : vector<16x256xf32>
    %c0_6 = arith.constant 0 : index
    %c0_7 = arith.constant 0 : index
    %7 = vector.load %arg4[%c0_6, %c0_7] : memref<16x1xf32, #tpu.memory_space<vmem>>, vector<16x1xf32>
    %8 = vector.broadcast %7 : vector<16x1xf32> to vector<16x256xf32>
    %9 = arith.addf %6, %8 : vector<16x256xf32>
    %c0_8 = arith.constant 0 : index
    %c0_9 = arith.constant 0 : index
    %10 = vector.load %arg7[%c0_8, %c0_9] : memref<16x16xf32, #tpu.memory_space<vmem>>, vector<16x16xf32>
    %cst_10 = arith.constant dense<0.000000e+00> : vector<16x256xf32>
    %11 = tpu.matmul %10, %1, %cst_10 {dimension_numbers = #tpu.dot_dimension_numbers<[1], [0], [0], [1], [0, 0, 1, 1], [], []>} : vector<16x16xf32>, vector<16x256xf32>, vector<16x256xf32> -> vector<16x256xf32>
    %12 = vector.extract_strided_slice %9 {offsets = [0, 0], sizes = [4, 256], strides = [1, 1]} : vector<16x256xf32> to vector<4x256xf32>
    %c0_11 = arith.constant 0 : index
    %c0_12 = arith.constant 0 : index
    %c0_13 = arith.constant 0 : index
    %13 = vector.load %arg5[%c0_11, %c0_12, %c0_13] : memref<4x256x64xf32, #tpu.memory_space<vmem>>, vector<1x256x64xf32>
    %14 = vector.shape_cast %13 : vector<1x256x64xf32> to vector<256x64xf32>
    %cst_14 = arith.constant dense<0.000000e+00> : vector<4x64xf32>
    %15 = tpu.matmul %12, %14, %cst_14 {dimension_numbers = #tpu.dot_dimension_numbers<[1], [0], [0], [1], [0, 0, 1, 1], [], []>} : vector<4x256xf32>, vector<256x64xf32>, vector<4x64xf32> -> vector<4x64xf32>
    %cst_15 = arith.constant 0.000000e+00 : f32
    %16 = vector.broadcast %cst_15 : f32 to vector<4x64xf32>
    %17 = arith.maximumf %15, %16 : vector<4x64xf32>
    %c0_16 = arith.constant 0 : index
    %c0_17 = arith.constant 0 : index
    %c0_18 = arith.constant 0 : index
    %18 = vector.load %arg6[%c0_16, %c0_17, %c0_18] : memref<4x64x256xf32, #tpu.memory_space<vmem>>, vector<1x64x256xf32>
    %19 = vector.shape_cast %18 : vector<1x64x256xf32> to vector<64x256xf32>
    %cst_19 = arith.constant dense<0.000000e+00> : vector<4x256xf32>
    %20 = tpu.matmul %17, %19, %cst_19 {dimension_numbers = #tpu.dot_dimension_numbers<[1], [0], [0], [1], [0, 0, 1, 1], [], []>} : vector<4x64xf32>, vector<64x256xf32>, vector<4x256xf32> -> vector<4x256xf32>
    %c0_20 = arith.constant 0 : index
    %c0_21 = arith.constant 0 : index
    %c0_22 = arith.constant 0 : index
    %21 = vector.load %arg8[%c0_20, %c0_21, %c0_22] : memref<4x16x4xf32, #tpu.memory_space<vmem>>, vector<1x16x4xf32>
    %22 = vector.shape_cast %21 : vector<1x16x4xf32> to vector<16x4xf32>
    %cst_23 = arith.constant dense<0.000000e+00> : vector<16x256xf32>
    %23 = tpu.matmul %22, %20, %cst_23 {dimension_numbers = #tpu.dot_dimension_numbers<[1], [0], [0], [1], [0, 0, 1, 1], [], []>} : vector<16x4xf32>, vector<4x256xf32>, vector<16x256xf32> -> vector<16x256xf32>
    %24 = arith.addf %11, %23 : vector<16x256xf32>
    %25 = vector.extract_strided_slice %9 {offsets = [4, 0], sizes = [4, 256], strides = [1, 1]} : vector<16x256xf32> to vector<4x256xf32>
    %c1 = arith.constant 1 : index
    %c0_24 = arith.constant 0 : index
    %c0_25 = arith.constant 0 : index
    %26 = vector.load %arg5[%c1, %c0_24, %c0_25] : memref<4x256x64xf32, #tpu.memory_space<vmem>>, vector<1x256x64xf32>
    %27 = vector.shape_cast %26 : vector<1x256x64xf32> to vector<256x64xf32>
    %cst_26 = arith.constant dense<0.000000e+00> : vector<4x64xf32>
    %28 = tpu.matmul %25, %27, %cst_26 {dimension_numbers = #tpu.dot_dimension_numbers<[1], [0], [0], [1], [0, 0, 1, 1], [], []>} : vector<4x256xf32>, vector<256x64xf32>, vector<4x64xf32> -> vector<4x64xf32>
    %cst_27 = arith.constant 0.000000e+00 : f32
    %29 = vector.broadcast %cst_27 : f32 to vector<4x64xf32>
    %30 = arith.maximumf %28, %29 : vector<4x64xf32>
    %c1_28 = arith.constant 1 : index
    %c0_29 = arith.constant 0 : index
    %c0_30 = arith.constant 0 : index
    %31 = vector.load %arg6[%c1_28, %c0_29, %c0_30] : memref<4x64x256xf32, #tpu.memory_space<vmem>>, vector<1x64x256xf32>
    %32 = vector.shape_cast %31 : vector<1x64x256xf32> to vector<64x256xf32>
    %cst_31 = arith.constant dense<0.000000e+00> : vector<4x256xf32>
    %33 = tpu.matmul %30, %32, %cst_31 {dimension_numbers = #tpu.dot_dimension_numbers<[1], [0], [0], [1], [0, 0, 1, 1], [], []>} : vector<4x64xf32>, vector<64x256xf32>, vector<4x256xf32> -> vector<4x256xf32>
    %c1_32 = arith.constant 1 : index
    %c0_33 = arith.constant 0 : index
    %c0_34 = arith.constant 0 : index
    %34 = vector.load %arg8[%c1_32, %c0_33, %c0_34] : memref<4x16x4xf32, #tpu.memory_space<vmem>>, vector<1x16x4xf32>
    %35 = vector.shape_cast %34 : vector<1x16x4xf32> to vector<16x4xf32>
    %cst_35 = arith.constant dense<0.000000e+00> : vector<16x256xf32>
    %36 = tpu.matmul %35, %33, %cst_35 {dimension_numbers = #tpu.dot_dimension_numbers<[1], [0], [0], [1], [0, 0, 1, 1], [], []>} : vector<16x4xf32>, vector<4x256xf32>, vector<16x256xf32> -> vector<16x256xf32>
    %37 = arith.addf %24, %36 : vector<16x256xf32>
    %38 = vector.extract_strided_slice %9 {offsets = [8, 0], sizes = [4, 256], strides = [1, 1]} : vector<16x256xf32> to vector<4x256xf32>
    %c2 = arith.constant 2 : index
    %c0_36 = arith.constant 0 : index
    %c0_37 = arith.constant 0 : index
    %39 = vector.load %arg5[%c2, %c0_36, %c0_37] : memref<4x256x64xf32, #tpu.memory_space<vmem>>, vector<1x256x64xf32>
    %40 = vector.shape_cast %39 : vector<1x256x64xf32> to vector<256x64xf32>
    %cst_38 = arith.constant dense<0.000000e+00> : vector<4x64xf32>
    %41 = tpu.matmul %38, %40, %cst_38 {dimension_numbers = #tpu.dot_dimension_numbers<[1], [0], [0], [1], [0, 0, 1, 1], [], []>} : vector<4x256xf32>, vector<256x64xf32>, vector<4x64xf32> -> vector<4x64xf32>
    %cst_39 = arith.constant 0.000000e+00 : f32
    %42 = vector.broadcast %cst_39 : f32 to vector<4x64xf32>
    %43 = arith.maximumf %41, %42 : vector<4x64xf32>
    %c2_40 = arith.constant 2 : index
    %c0_41 = arith.constant 0 : index
    %c0_42 = arith.constant 0 : index
    %44 = vector.load %arg6[%c2_40, %c0_41, %c0_42] : memref<4x64x256xf32, #tpu.memory_space<vmem>>, vector<1x64x256xf32>
    %45 = vector.shape_cast %44 : vector<1x64x256xf32> to vector<64x256xf32>
    %cst_43 = arith.constant dense<0.000000e+00> : vector<4x256xf32>
    %46 = tpu.matmul %43, %45, %cst_43 {dimension_numbers = #tpu.dot_dimension_numbers<[1], [0], [0], [1], [0, 0, 1, 1], [], []>} : vector<4x64xf32>, vector<64x256xf32>, vector<4x256xf32> -> vector<4x256xf32>
    %c2_44 = arith.constant 2 : index
    %c0_45 = arith.constant 0 : index
    %c0_46 = arith.constant 0 : index
    %47 = vector.load %arg8[%c2_44, %c0_45, %c0_46] : memref<4x16x4xf32, #tpu.memory_space<vmem>>, vector<1x16x4xf32>
    %48 = vector.shape_cast %47 : vector<1x16x4xf32> to vector<16x4xf32>
    %cst_47 = arith.constant dense<0.000000e+00> : vector<16x256xf32>
    %49 = tpu.matmul %48, %46, %cst_47 {dimension_numbers = #tpu.dot_dimension_numbers<[1], [0], [0], [1], [0, 0, 1, 1], [], []>} : vector<16x4xf32>, vector<4x256xf32>, vector<16x256xf32> -> vector<16x256xf32>
    %50 = arith.addf %37, %49 : vector<16x256xf32>
    %51 = vector.extract_strided_slice %9 {offsets = [12, 0], sizes = [4, 256], strides = [1, 1]} : vector<16x256xf32> to vector<4x256xf32>
    %c3 = arith.constant 3 : index
    %c0_48 = arith.constant 0 : index
    %c0_49 = arith.constant 0 : index
    %52 = vector.load %arg5[%c3, %c0_48, %c0_49] : memref<4x256x64xf32, #tpu.memory_space<vmem>>, vector<1x256x64xf32>
    %53 = vector.shape_cast %52 : vector<1x256x64xf32> to vector<256x64xf32>
    %cst_50 = arith.constant dense<0.000000e+00> : vector<4x64xf32>
    %54 = tpu.matmul %51, %53, %cst_50 {dimension_numbers = #tpu.dot_dimension_numbers<[1], [0], [0], [1], [0, 0, 1, 1], [], []>} : vector<4x256xf32>, vector<256x64xf32>, vector<4x64xf32> -> vector<4x64xf32>
    %cst_51 = arith.constant 0.000000e+00 : f32
    %55 = vector.broadcast %cst_51 : f32 to vector<4x64xf32>
    %56 = arith.maximumf %54, %55 : vector<4x64xf32>
    %c3_52 = arith.constant 3 : index
    %c0_53 = arith.constant 0 : index
    %c0_54 = arith.constant 0 : index
    %57 = vector.load %arg6[%c3_52, %c0_53, %c0_54] : memref<4x64x256xf32, #tpu.memory_space<vmem>>, vector<1x64x256xf32>
    %58 = vector.shape_cast %57 : vector<1x64x256xf32> to vector<64x256xf32>
    %cst_55 = arith.constant dense<0.000000e+00> : vector<4x256xf32>
    %59 = tpu.matmul %56, %58, %cst_55 {dimension_numbers = #tpu.dot_dimension_numbers<[1], [0], [0], [1], [0, 0, 1, 1], [], []>} : vector<4x64xf32>, vector<64x256xf32>, vector<4x256xf32> -> vector<4x256xf32>
    %c3_56 = arith.constant 3 : index
    %c0_57 = arith.constant 0 : index
    %c0_58 = arith.constant 0 : index
    %60 = vector.load %arg8[%c3_56, %c0_57, %c0_58] : memref<4x16x4xf32, #tpu.memory_space<vmem>>, vector<1x16x4xf32>
    %61 = vector.shape_cast %60 : vector<1x16x4xf32> to vector<16x4xf32>
    %cst_59 = arith.constant dense<0.000000e+00> : vector<16x256xf32>
    %62 = tpu.matmul %61, %59, %cst_59 {dimension_numbers = #tpu.dot_dimension_numbers<[1], [0], [0], [1], [0, 0, 1, 1], [], []>} : vector<16x4xf32>, vector<4x256xf32>, vector<16x256xf32> -> vector<16x256xf32>
    %63 = arith.addf %50, %62 : vector<16x256xf32>
    %c0_60 = arith.constant 0 : index
    %c0_61 = arith.constant 0 : index
    %64 = vector.load %arg9[%c0_60, %c0_61] : memref<16x1xf32, #tpu.memory_space<vmem>>, vector<16x1xf32>
    %65 = vector.broadcast %64 : vector<16x1xf32> to vector<16x256xf32>
    %66 = arith.mulf %63, %65 : vector<16x256xf32>
    %c0_62 = arith.constant 0 : index
    %c0_63 = arith.constant 0 : index
    %67 = vector.load %arg10[%c0_62, %c0_63] : memref<16x1xf32, #tpu.memory_space<vmem>>, vector<16x1xf32>
    %68 = vector.broadcast %67 : vector<16x1xf32> to vector<16x256xf32>
    %69 = arith.addf %66, %68 : vector<16x256xf32>
    %cst_64 = arith.constant 0.000000e+00 : f32
    %70 = vector.broadcast %cst_64 : f32 to vector<16x256xf32>
    %71 = arith.maximumf %69, %70 : vector<16x256xf32>
    %c0_65 = arith.constant 0 : index
    %c0_66 = arith.constant 0 : index
    %c0_67 = arith.constant 0 : index
    %72 = vector.load %arg11[%c0_65, %c0_66, %c0_67] : memref<1x16x256xf32, #tpu.memory_space<vmem>>, vector<1x16x256xf32>
    %73 = vector.shape_cast %72 : vector<1x16x256xf32> to vector<16x256xf32>
    %74 = vector.shape_cast %71 : vector<16x256xf32> to vector<1x16x256xf32>
    tpu.vector_store %arg11[%c0_65, %c0_66, %c0_67], %74 {strides = array<i32>} : memref<1x16x256xf32, #tpu.memory_space<vmem>>, vector<1x16x256xf32>,
    return
  }
  func.func @transform_0(%arg0: i32) -> (i32, i32, i32) {
    %c0_i32 = arith.constant 0 : i32
    %c0_i32_0 = arith.constant 0 : i32
    %c0_i32_1 = arith.constant 0 : i32
    return %arg0, %c0_i32, %c0_i32_0 : i32, i32, i32
  }
  func.func @transform_1(%arg0: i32) -> (i32, i32) {
    %c0_i32 = arith.constant 0 : i32
    %c0_i32_0 = arith.constant 0 : i32
    %c0_i32_1 = arith.constant 0 : i32
    return %c0_i32, %c0_i32_0 : i32, i32
  }
  func.func @transform_2(%arg0: i32) -> (i32, i32) {
    %c0_i32 = arith.constant 0 : i32
    %c0_i32_0 = arith.constant 0 : i32
    %c0_i32_1 = arith.constant 0 : i32
    return %c0_i32, %c0_i32_0 : i32, i32
  }
  func.func @transform_3(%arg0: i32) -> (i32, i32) {
    %c0_i32 = arith.constant 0 : i32
    %c0_i32_0 = arith.constant 0 : i32
    %c0_i32_1 = arith.constant 0 : i32
    return %c0_i32, %c0_i32_0 : i32, i32
  }
  func.func @transform_4(%arg0: i32) -> (i32, i32, i32) {
    %c0_i32 = arith.constant 0 : i32
    %c0_i32_0 = arith.constant 0 : i32
    %c0_i32_1 = arith.constant 0 : i32
    %c0_i32_2 = arith.constant 0 : i32
    return %c0_i32, %c0_i32_0, %c0_i32_1 : i32, i32, i32
  }
  func.func @transform_5(%arg0: i32) -> (i32, i32, i32) {
    %c0_i32 = arith.constant 0 : i32
    %c0_i32_0 = arith.constant 0 : i32
    %c0_i32_1 = arith.constant 0 : i32
    %c0_i32_2 = arith.constant 0 : i32
    return %c0_i32, %c0_i32_0, %c0_i32_1 : i32, i32, i32
  }
  func.func @transform_6(%arg0: i32) -> (i32, i32) {
    %c0_i32 = arith.constant 0 : i32
    %c0_i32_0 = arith.constant 0 : i32
    %c0_i32_1 = arith.constant 0 : i32
    return %c0_i32, %c0_i32_0 : i32, i32
  }
  func.func @transform_7(%arg0: i32) -> (i32, i32, i32) {
    %c0_i32 = arith.constant 0 : i32
    %c0_i32_0 = arith.constant 0 : i32
    %c0_i32_1 = arith.constant 0 : i32
    %c0_i32_2 = arith.constant 0 : i32
    return %c0_i32, %c0_i32_0, %c0_i32_1 : i32, i32, i32
  }
  func.func @transform_8(%arg0: i32) -> (i32, i32) {
    %c0_i32 = arith.constant 0 : i32
    %c0_i32_0 = arith.constant 0 : i32
    %c0_i32_1 = arith.constant 0 : i32
    return %c0_i32, %c0_i32_0 : i32, i32
  }
  func.func @transform_9(%arg0: i32) -> (i32, i32) {
    %c0_i32 = arith.constant 0 : i32
    %c0_i32_0 = arith.constant 0 : i32
    %c0_i32_1 = arith.constant 0 : i32
    return %c0_i32, %c0_i32_0 : i32, i32
  }
  func.func @transform_10(%arg0: i32) -> (i32, i32, i32) {
    %c0_i32 = arith.constant 0 : i32
    %c0_i32_0 = arith.constant 0 : i32
    %c0_i32_1 = arith.constant 0 : i32
    return %arg0, %c0_i32, %c0_i32_0 : i32, i32, i32
  }
}

</mosaic_0001>

<bundles_post_ra>
// kernel: tpu_custom_call.1
= control target key start
LH: loop header
LB: loop body
LE: loop exit
PB: predicated region body
PF: predicated region fallthrough
CT: control target
= control target key end

     0   :  { %15 = vsyncpa [#allocation3], 0  ;;  %s3383_s0 = inlined_call_operand.vmem [shape: f32[2,16,256], index: 0, kind: input, shape index: {}]   ;;  %s3384_s1 = inlined_call_operand.vmem [shape: f32[16,16], index: 1, kind: input, shape index: {}]   ;;  %s3385_s2 = inlined_call_operand.vmem [shape: f32[16,1], index: 2, kind: input, shape index: {}]   ;;  %s3386_s3 = inlined_call_operand.vmem [shape: f32[16,1], index: 3, kind: input, shape index: {}]   ;;  %s3387_s4 = inlined_call_operand.vmem [shape: f32[4,256,64], index: 4, kind: input, shape index: {}]   ;;  %s3388_s5 = inlined_call_operand.vmem [shape: f32[4,64,256], index: 5, kind: input, shape index: {}]   ;;  %s3389_s6 = inlined_call_operand.vmem [shape: f32[16,16], index: 6, kind: input, shape index: {}]   ;;  %s3390_s7 = inlined_call_operand.vmem [shape: f32[4,16,4], index: 7, kind: input, shape index: {}]   ;;  %s3391_s8 = inlined_call_operand.vmem [shape: f32[16,1], index: 8, kind: input, shape index: {}]   ;;  %s3392_s9 = inlined_call_operand.vmem [shape: f32[16,1], index: 9, kind: input, shape index: {}]   ;;  %s3393_s10 = inlined_call_operand.hbm [shape: f32[2,16,256], index: 10, kind: output, shape index: {}]  }
   0x1   :  { %17 = vsyncpa [#allocation3 + $0x1], 0  ;;  %s2566_s13 = smov 0   ;;  %s2568_s14 = smov 0  }
   0x2   :  { %s2570_s15 = smov 0   ;;  %s2572_s16 = smov 0  }
   0x3 LB: > { %3395 = sst [smem:[#allocation5_spill]] %s2500_s15  ;;  %s2587_s17 = sadd.s32 4294967295, %s2504_s16   ;;  %s2504_s16 = sphi %s2572_s16, %s3403_s16   ;;  %s2500_s15 = sphi %s2570_s15, %s3400_s15   ;;  %s2496_s14 = sphi %s2568_s14, %s3402_s14   ;;  %s2492_s13 = sphi %s2566_s13, %s3401_s13  }
   0x4   : > { %s1853_s18 = sadd.s32 4294967294, %s2504_s16   ;;  %s2591_s19 = sadd.s32 1, %s2504_s16  }
   0x5   : > { %s245_s20 = sadd.s32 1, %s2500_s15  ;;  %s242_s21 = ssub.s32 %s2504_s16, %s2591_s19 }
   0x6   : > { %p255_p0 = scmp.ne.s32.totalorder %s2500_s15, %s2496_s14  ;;  %p243_p1 = scmp.eq.s32.totalorder %s242_s21, 0 }
   0x7   : > { %p256_p2 = scmp.eq.s32.totalorder %s2587_s17, 1  ;;  %p261_p3 = scmp.ne.s32.totalorder %s2496_s14, %s2492_s13 }
   0x8   : > { %p262_p4 = scmp.eq.s32.totalorder %s1853_s18, 1  ;;  %p1856_p7 = scmp.ge.s32.totalorder %s2504_s16, 1 }
   0x9   : > { %s2602_s22 = scalar_select %p243_p1, %s2500_s15, %s245_s20  }
   0xa   : > { %p2604_p5 = por %p256_p2, %p255_p0  ;;  %p2608_p6 = por %p262_p4, %p261_p3 }
   0xb   : > { %3396 = sst [smem:[#allocation6_spill]] %s2602_s22  ;;  %p315_p8 = scmp.lt.s32.totalorder %s2504_s16, 3 }
   0xd   : > { %p316_p9 = pnand %p1856_p7, %p315_p8 }
   0xe   : > { %p353_p10 = scmp.lt.s32.totalorder (!%p316_p9), %s2587_s17, 1  ;;  %v448_v0 = vld [vmem:[%s3385_s2] sm:$0xff] (!%p316_p9)  ;;  %v2506_v1 = vmov (!%p316_p9), 0.0   ;;  %v2507_v2 = vmov (!%p316_p9), 0   ;;  %v499_v5 = vld [vmem:[%s3387_s4 + $0x88] sm:$0xff] (!%p316_p9)  ;;  %v500_v9 = vld [vmem:[%s3387_s4 + $0x90] sm:$0xff] (!%p316_p9) }
   0xf   : > { %319 = sbr.rel (%p316_p9) target bundleno = 1873 (0x751), region = 60  ;;  %435 = vmatprep.mubr.f32.mxu0 (!%p316_p9), %v2506_v1  ;;  %2440 = vset.pattern.permute.xlu0 (!%p316_p9), %v2507_v2  ;;  %v464_v3 = vld [vmem:[%s3386_s3] sm:$0xff] (!%p316_p9)  ;;  %v483_v8 = vld [vmem:[%s3387_s4 + $0x8] sm:$0xff] (!%p316_p9)  ;;  %v501_v10 = vld [vmem:[%s3387_s4 + $0x98] sm:$0xff] (!%p316_p9)  ;;  %vm364_vm0 = vcmask (!%p316_p9), 130048   ;;  %vm601_vm1 = vcmask (!%p316_p9), 523264  }
  0x10   : > { %452 = vperm.xlu0 (!%p316_p9), %2440, %v448_v0   ;;  %v498_v4 = vld [vmem:[%s3387_s4 + $0x80] sm:$0xff] (!%p316_p9)  ;;  %2441 = vset.pattern.permute.xlu1 (!%p316_p9), %v2507_v2  ;;  %v2189_v12 = vpack.c.bf16 (!%p316_p9), %v501_v10, %v500_v9  ;;  %v484_v13 = vld [vmem:[%s3387_s4 + $0x10] sm:$0xff] (!%p316_p9)  ;;  %v485_v14 = vld [vmem:[%s3387_s4 + $0x18] sm:$0xff] (!%p316_p9)  ;;  %vm685_vm2 = vcmask (!%p316_p9), 1043456   ;;  %vm678_vm3 = vcmask (!%p316_p9), 31744   ;;  %s350_s28 = sand.u32 (!%p316_p9), 1, %s2496_s14  }
  0x11   : > { %v482_v6 = vld [vmem:[%s3387_s4] sm:$0xff] (!%p316_p9)  ;;  %v2185_v7 = vpack.c.bf16 (!%p316_p9), %v499_v5, %v498_v4  ;;  %v503_v16 = vld [vmem:[%s3387_s4 + $0xa8] sm:$0xff] (!%p316_p9)  ;;  %v2191_v23 = vpack.c.bf16 (!%p316_p9), %v485_v14, %v484_v13  ;;  %v504_v28 = vld [vmem:[%s3387_s4 + $0xb0] sm:$0xff] (!%p316_p9)  ;;  %s2040_s11 = sshll.u32 (!%p316_p9), %s2587_s17, 9  ;;  %s2508_s21 = smov (!%p316_p9), [#allocation2]  }
  0x12   : > { %v2187_v11 = vpack.c.bf16 (!%p316_p9), %v483_v8, %v482_v6  ;;  %v502_v15 = vld [vmem:[%s3387_s4 + $0xa0] sm:$0xff] (!%p316_p9)  ;;  %v487_v27 = vld [vmem:[%s3387_s4 + $0x28] sm:$0xff] (!%p316_p9)  ;;  %v505_v29 = vld [vmem:[%s3387_s4 + $0xb8] sm:$0xff] (!%p316_p9)  ;;  %s3338_s18 = scalar_lea.hbm (!%p316_p9), %s3393_s10, %s2040_s11  ;;  %s2446_s25 = sshll.u32 (!%p316_p9), %s2508_s21, 4  ;;  %s2447_s25 = int_to_ptr.vmem [resolvable:$false] %s2446_s25 }
  0x13   : > { %2186 = vmatprep.subr.bf16.mxu1 (!%p316_p9), %v2185_v7  ;;  %v1737_v22 = vld [vmem:[%s3391_s8] sm:$0xff] (!%p316_p9)  ;;  %v2193_v25 = vpack.c.bf16 (!%p316_p9), %v503_v16, %v502_v15  ;;  %v2197_v33 = vpack.c.bf16 (!%p316_p9), %v505_v29, %v504_v28  ;;  %v488_v34 = vld [vmem:[%s3387_s4 + $0x30] sm:$0xff] (!%p316_p9)  ;;  %v489_v35 = vld [vmem:[%s3387_s4 + $0x38] sm:$0xff] (!%p316_p9)  ;;  %s2448_s26 = scalar_lea.vmem (!%p316_p9), %s2447_s25, 1024 }
  0x14   : > { %468 = vperm.xlu0 (!%p316_p9), %2440, %v464_v3   ;;  %2188 = vmatpush3.bf16.msra.mxu1 (!%p316_p9), %v2187_v11  ;;  %v486_v26 = vld [vmem:[%s3387_s4 + $0x20] sm:$0xff] (!%p316_p9)  ;;  %v507_v37 = vld [vmem:[%s3387_s4 + $0xc8] sm:$0xff] (!%p316_p9)  ;;  %v2199_v38 = vpack.c.bf16 (!%p316_p9), %v489_v35, %v488_v34  ;;  %v508_v42 = vld [vmem:[%s3387_s4 + $0xd0] sm:$0xff] (!%p316_p9) }
  0x15   : > { %2190 = vmatprep.subr.bf16.mxu1 (!%p316_p9), %v2189_v12  ;;  %v362_v30 = vld [vmem:[%s3384_s1] sm:$0xff] (!%p316_p9)  ;;  %v2195_v32 = vpack.c.bf16 (!%p316_p9), %v487_v27, %v486_v26  ;;  %v491_v41 = vld [vmem:[%s3387_s4 + $0x48] sm:$0xff] (!%p316_p9)  ;;  %v509_v43 = vld [vmem:[%s3387_s4 + $0xd8] sm:$0xff] (!%p316_p9) }
  0x16   : > { %s354_s29 = scalar_select %p353_p10, %s2587_s17, 1  ;;  %v1753_v31 = vld [vmem:[%s3392_s9] sm:$0xff]  ;;  %v2205_v45 = vpack.c.bf16 %v509_v43, %v508_v42  ;;  %v492_v46 = vld [vmem:[%s3387_s4 + $0x50] sm:$0xff]  ;;  %v493_v47 = vld [vmem:[%s3387_s4 + $0x58] sm:$0xff] }
  0x17   : > { %v506_v36 = vld [vmem:[%s3387_s4 + $0xc0] sm:$0xff]  ;;  %v511_v49 = vld [vmem:[%s3387_s4 + $0xe8] sm:$0xff]  ;;  %v2207_v50 = vpack.c.bf16 %v493_v47, %v492_v46  ;;  %v512_v55 = vld [vmem:[%s3387_s4 + $0xf0] sm:$0xff]  ;;  %s3342_s17 = scalar_lea.sflag [#allocation3], %s350_s28 }
  0x18   : > { %s2039_s12 = sshll.u32 %s354_s29, 5  ;;  %1741 = vperm.xlu0 %2440, %v1737_v22   ;;  %2192 = vmatpush3.bf16.msra.mxu1 %v2191_v23  ;;  %v2201_v39 = vpack.c.bf16 %v507_v37, %v506_v36  ;;  %v490_v40 = vld [vmem:[%s3387_s4 + $0x40] sm:$0xff]  ;;  %v495_v53 = vld [vmem:[%s3387_s4 + $0x68] sm:$0xff]  ;;  %v513_v56 = vld [vmem:[%s3387_s4 + $0xf8] sm:$0xff]  ;;  %s1857_s29 = sshll.u32 %s350_s28, 5 }
  0x19   : > { %s357_s27 = scalar_lea.vmem %s3383_s0, %s2039_s12  ;;  %2194 = vmatprep.subr.bf16.mxu1 %v2193_v25  ;;  %v2203_v44 = vpack.c.bf16 %v491_v41, %v490_v40  ;;  %v510_v48 = vld [vmem:[%s3387_s4 + $0xe0] sm:$0xff]  ;;  %v2213_v57 = vpack.c.bf16 %v513_v56, %v512_v55  ;;  %v496_v58 = vld [vmem:[%s3387_s4 + $0x70] sm:$0xff]  ;;  %v497_v59 = vld [vmem:[%s3387_s4 + $0x78] sm:$0xff]  ;;  %s352_s30 = scalar_lea.vmem [#allocation2], %s1857_s29 }
  0x1a   : > { %v359_v17 = vld [vmem:[%s357_s27 + $0x8] sm:$0xff]  ;;  %v361_v18 = vld [vmem:[%s357_s27 + $0x18] sm:$0xff]  ;;  %v358_v19 = vld [vmem:[%s357_s27] sm:$0xff]  ;;  %v2209_v51 = vpack.c.bf16 %v511_v49, %v510_v48  ;;  %v2215_v60 = vpack.c.bf16 %v497_v59, %v496_v58  ;;  %s1791_s22 = sshll.u32 %s352_s30, 4  ;;  %s3333_s22 = int_to_ptr.vmem [resolvable:$true] %s1791_s22 }
  0x1b   : > { %v2656_v20 = vpack.c.bf16 %v361_v18, %v359_v17  ;;  %v360_v21 = vld [vmem:[%s357_s27 + $0x10] sm:$0xff]  ;;  %v494_v52 = vld [vmem:[%s3387_s4 + $0x60] sm:$0xff]  ;;  %v586_v61 = vld [vmem:[%s3388_s5 + $0x8] sm:$0xff]  ;;  %s2442_s20 = scalar_lea.vmem %s3333_s22, 512  ;;  %p2449_p0 = scmp.lt.s32.totalorder %s3333_s22, %s2447_s25 }
  0x1c   : > { %v2661_v24 = vpack.c.bf16 %v360_v21, %v358_v19  ;;  %1757 = vperm.xlu0 %2440, %v1753_v31   ;;  %2196 = vmatpush3.bf16.msra.mxu1 %v2195_v32  ;;  %v2211_v54 = vpack.c.bf16 %v495_v53, %v494_v52  ;;  %v588_v62 = vld [vmem:[%s3388_s5 + $0x18] sm:$0xff]  ;;  %v585_v63 = vld [vmem:[%s3388_s5] sm:$0xff]  ;;  %v587_v2 = vld [vmem:[%s3388_s5 + $0x10] sm:$0xff]  ;;  %p2443_p11 = scmp.ne.s32.totalorder %s3333_s22, %s2442_s20  ;;  %p2450_p1 = scmp.lt.s32.totalorder %s2448_s26, %s2442_s20 }
  0x1d   : > { %2182 = vmatprep.subr.bf16.mxu0 %v2656_v20  ;;  %2198 = vmatprep.subr.bf16.mxu1 %v2197_v33  ;;  %v2217_v0 = vpack.c.bf16 %v588_v62, %v586_v61  ;;  %v590_v3 = vld [vmem:[%s3388_s5 + $0x28] sm:$0xff]  ;;  %v592_v4 = vld [vmem:[%s3388_s5 + $0x38] sm:$0xff]  ;;  %v2219_v5 = vpack.c.bf16 %v587_v2, %v585_v63  ;;  %v589_v7 = vld [vmem:[%s3388_s5 + $0x20] sm:$0xff] }
  0x1e   : > { %2184 = vmatpush1.bf16.msra.mxu0 %v2661_v24  ;;  %v2221_v6 = vpack.c.bf16 %v592_v4, %v590_v3  ;;  %v591_v8 = vld [vmem:[%s3388_s5 + $0x30] sm:$0xff]  ;;  %v594_v9 = vld [vmem:[%s3388_s5 + $0x48] sm:$0xff]  ;;  %v596_v10 = vld [vmem:[%s3388_s5 + $0x58] sm:$0xff]  ;;  %p2444_p12 = pnand %p2443_p11, %p2604_p5  ;;  %p2451_p2 = por %p2450_p1, %p2449_p0 }
  0x1f   : > { %2218 = vmatprep.subr.bf16.mxu0 %v2217_v0  ;;  %v2223_v11 = vpack.c.bf16 %v591_v8, %v589_v7  ;;  %v2225_v12 = vpack.c.bf16 %v596_v10, %v594_v9  ;;  %v593_v13 = vld [vmem:[%s3388_s5 + $0x40] sm:$0xff]  ;;  %v595_v14 = vld [vmem:[%s3388_s5 + $0x50] sm:$0xff]  ;;  %v598_v26 = vld [vmem:[%s3388_s5 + $0x68] sm:$0xff] }
  0x20   : > { %2200 = vmatpush3.bf16.msra.mxu1 %v2199_v38  ;;  %v2227_v15 = vpack.c.bf16 %v595_v14, %v593_v13  ;;  %v600_v27 = vld [vmem:[%s3388_s5 + $0x78] sm:$0xff]  ;;  %v363_v28 = vld [vmem:[%s3384_s1 + $0x8] sm:$0xff]  ;;  %v599_v31 = vld [vmem:[%s3388_s5 + $0x70] sm:$0xff]  ;;  %p2445_p13 = pneg %p2444_p12 }
  0x21   : > { %1860 = vmatmul.mubr.msk.f32.vlgmr.msra.gmra.mrb[0].mxu0 %vm364_vm0, %v362_v30  ;;  %2202 = vmatprep.subr.bf16.mxu1 %v2201_v39  ;;  %v2229_v29 = vpack.c.bf16 %v600_v27, %v598_v26  ;;  %v597_v30 = vld [vmem:[%s3388_s5 + $0x60] sm:$0xff]  ;;  %v449_v33 = vld [vmem:[%s3385_s2 + $0x8] sm:$0xff]  ;;  %v1903_v46 = vld [vmem:[%s3388_s5 + $0x90] sm:$0xff] }
  0x22   : > { %441 = vmatprep.mubr.f32.mxu0 %v2506_v1  ;;  %2220 = vmatpush1.bf16.msra.mxu0 %v2219_v5  ;;  %v2231_v32 = vpack.c.bf16 %v599_v31, %v597_v30  ;;  %v465_v34 = vld [vmem:[%s3386_s3 + $0x8] sm:$0xff]  ;;  %v1907_v53 = vld [vmem:[%s3388_s5 + $0xb0] sm:$0xff]  ;;  %v1912_v55 = vld [vmem:[%s3388_s5 + $0xd8] sm:$0xff]  ;;  %p2452_p3 = pnand %p2451_p2, %p2445_p13 }
  0x23   : > { %2222 = vmatprep.subr.bf16.mxu0 %v2221_v6  ;;  %457 = vperm.xlu1 %2441, %v449_v33   ;;  %v1738_v41 = vld [vmem:[%s3391_s8 + $0x8] sm:$0xff]  ;;  %v1909_v58 = vld [vmem:[%s3388_s5 + $0xc0] sm:$0xff]  ;;  %v1911_v59 = vld [vmem:[%s3388_s5 + $0xd0] sm:$0xff] }
  0x24   : > { %2204 = vmatpush3.bf16.msra.mxu1 %v2203_v44  ;;  %v1754_v42 = vld [vmem:[%s3392_s9 + $0x8] sm:$0xff]  ;;  %v1904_v44 = vld [vmem:[%s3388_s5 + $0x98] sm:$0xff]  ;;  %v1885_v61 = vld [vmem:[%s3387_s4 + $0x180] sm:$0xff] }
  0x25   : > { %2206 = vmatprep.subr.bf16.mxu1 %v2205_v45  ;;  %1861 = vmatmul.mubr.msk.f32.gmra.mrb[2].mxu0 %vm364_vm0, %v363_v28  ;;  %v1902_v43 = vld [vmem:[%s3388_s5 + $0x88] sm:$0xff]  ;;  %v1901_v45 = vld [vmem:[%s3388_s5 + $0x80] sm:$0xff]  ;;  %v1871_v10 = vld [vmem:[%s3387_s4 + $0x110] sm:$0xff] }
  0x26   : > { %2224 = vmatpush1.bf16.msra.mxu0 %v2223_v11  ;;  %669 = vmatprep.mubr.f32.mxu0 %v2506_v1  ;;  %v2269_v47 = vpack.c.bf16 %v1904_v44, %v1902_v43  ;;  %v2271_v48 = vpack.c.bf16 %v1903_v46, %v1901_v45  ;;  %v1906_v49 = vld [vmem:[%s3388_s5 + $0xa8] sm:$0xff]  ;;  %v676_v2 = vld [vmem:[%s3390_s7] sm:$0xff]  ;;  %v1872_v11 = vld [vmem:[%s3387_s4 + $0x118] sm:$0xff] }
  0x27   : > { %2226 = vmatprep.subr.bf16.mxu0 %v2225_v12  ;;  %473 = vperm.xlu1 %2441, %v465_v34   ;;  %v1886_v62 = vld [vmem:[%s3387_s4 + $0x188] sm:$0xff]  ;;  %v1869_v5 = vld [vmem:[%s3387_s4 + $0x100] sm:$0xff]  ;;  %v1875_v28 = vld [vmem:[%s3387_s4 + $0x130] sm:$0xff] }
  0x28   : > { %2208 = vmatpush3.bf16.msra.mxu1 %v2207_v50  ;;  %v1908_v50 = vld [vmem:[%s3388_s5 + $0xb8] sm:$0xff]  ;;  %v2237_v3 = vpack.c.bf16 %v1886_v62, %v1885_v61  ;;  %v677_v4 = vld [vmem:[%s3390_s7 + $0x8] sm:$0xff]  ;;  %v480_v7 = vld [vmem:[%s3389_s6] sm:$0xff] }
  0x29   : > { %2210 = vmatprep.subr.bf16.mxu1 %v2209_v51  ;;  %v1905_v51 = vld [vmem:[%s3388_s5 + $0xa0] sm:$0xff]  ;;  %v2273_v52 = vpack.c.bf16 %v1908_v50, %v1906_v49  ;;  %v1870_v6 = vld [vmem:[%s3387_s4 + $0x108] sm:$0xff]  ;;  %v1899_v49 = vld [vmem:[%s3387_s4 + $0x1f0] sm:$0xff] }
  0x2a   : > { %2228 = vmatpush1.bf16.msra.mxu0 %v2227_v15  ;;  %v2275_v56 = vpack.c.bf16 %v1907_v53, %v1905_v51  ;;  %v2239_v8 = vpack.c.bf16 %v1870_v6, %v1869_v5  ;;  %v1889_v12 = vld [vmem:[%s3387_s4 + $0x1a0] sm:$0xff]  ;;  %v1890_v13 = vld [vmem:[%s3387_s4 + $0x1a8] sm:$0xff]  ;;  %v2243_v15 = vpack.c.bf16 %v1872_v11, %v1871_v10  ;;  %v1900_v50 = vld [vmem:[%s3387_s4 + $0x1f8] sm:$0xff] }
  0x2b   : > { %2230 = vmatprep.subr.bf16.mxu0 %v2229_v29  ;;  %1746 = vperm.xlu1 %2441, %v1738_v41   ;;  %v481_v14 = vld [vmem:[%s3389_s6 + $0x8] sm:$0xff]  ;;  %v1893_v29 = vld [vmem:[%s3387_s4 + $0x1c0] sm:$0xff]  ;;  %v1879_v41 = vld [vmem:[%s3387_s4 + $0x150] sm:$0xff] }
  0x2c   : > { %2212 = vmatpush3.bf16.msra.mxu1 %v2211_v54  ;;  %v1910_v54 = vld [vmem:[%s3388_s5 + $0xc8] sm:$0xff]  ;;  %v1877_v33 = vld [vmem:[%s3387_s4 + $0x140] sm:$0xff]  ;;  %v1883_v53 = vld [vmem:[%s3387_s4 + $0x170] sm:$0xff] }
  0x2d   : > { %2214 = vmatprep.subr.bf16.mxu1 %v2213_v57  ;;  %v2277_v57 = vpack.c.bf16 %v1912_v55, %v1910_v54  ;;  %v1894_v30 = vld [vmem:[%s3387_s4 + $0x1c8] sm:$0xff]  ;;  %v1897_v43 = vld [vmem:[%s3387_s4 + $0x1e0] sm:$0xff]  ;;  %v1884_v54 = vld [vmem:[%s3387_s4 + $0x178] sm:$0xff] }
  0x2e   : > { %2232 = vmatpush1.bf16.msra.mxu0 %v2231_v32  ;;  %v2253_v32 = vpack.c.bf16 %v1894_v30, %v1893_v29  ;;  %v1878_v34 = vld [vmem:[%s3387_s4 + $0x148] sm:$0xff]  ;;  %v2267_v55 = vpack.c.bf16 %v1884_v54, %v1883_v53  ;;  %v1940_v62 = vld [vmem:[%s3387_s4 + $0x280] sm:$0xff]  ;;  %v1931_v29 = vld [vmem:[%s3387_s4 + $0x238] sm:$0xff] }
  0x2f   : > { %1762 = vperm.xlu1 %2441, %v1754_v42   ;;  %v1880_v42 = vld [vmem:[%s3387_s4 + $0x158] sm:$0xff]  ;;  %v1898_v44 = vld [vmem:[%s3387_s4 + $0x1e8] sm:$0xff]  ;;  %v1948_v30 = vld [vmem:[%s3387_s4 + $0x2c0] sm:$0xff] }
  0x30   : > { %2216 = vmatpush3.bf16.msra.mxu1 %v2215_v60  ;;  %v2279_v60 = vpack.c.bf16 %v1911_v59, %v1909_v58  ;;  %v2259_v45 = vpack.c.bf16 %v1880_v42, %v1879_v41  ;;  %v2261_v46 = vpack.c.bf16 %v1898_v44, %v1897_v43  ;;  %v1916_v58 = vld [vmem:[%s3388_s5 + $0xf8] sm:$0xff]  ;;  %v1925_v5 = vld [vmem:[%s3387_s4 + $0x208] sm:$0xff]  ;;  %v1934_v42 = vld [vmem:[%s3387_s4 + $0x250] sm:$0xff] }
  0x31   : > { %2270 = vmatprep.subr.bf16.mxu1 %v2269_v47  ;;  %v1881_v47 = vld [vmem:[%s3387_s4 + $0x160] sm:$0xff]  ;;  %v1935_v43 = vld [vmem:[%s3387_s4 + $0x258] sm:$0xff]  ;;  %v1938_v54 = vld [vmem:[%s3387_s4 + $0x270] sm:$0xff] }
  0x32   : > { %v1952_v44 = vld [vmem:[%s3387_s4 + $0x2e0] sm:$0xff] }
  0x8f   : > { %v453_v16 = vpop.permute.xlu0 %452 }
  0x93   : > { %v469_v22 = vpop.permute.xlu0 %468 }
  0xf4   : > { %v437_v17 = vpop.f32.mrb[0].mxu0 }
  0xf5   : > { %v460_v18 = vmul.f32 %v453_v16, %v437_v17  ;;  %v439_v19 = vpop.f32.mrb[1].mxu0  ;;  %v1873_v17 = vld [vmem:[%s3387_s4 + $0x120] sm:$0xff] }
  0xf6   : > { %v461_v21 = vmul.f32 %v453_v16, %v439_v19  ;;  %v2245_v16 = vpack.c.bf16 %v1890_v13, %v1889_v12  ;;  %v1926_v13 = vld [vmem:[%s3387_s4 + $0x210] sm:$0xff] }
  0xf7   : > { %v2777_v25 = vadd.f32 %v469_v22, %v460_v18  ;;  %v1874_v18 = vld [vmem:[%s3387_s4 + $0x128] sm:$0xff] }
  0xf8   : > { %v2775_v23 = vadd.f32 %v469_v22, %v461_v21  ;;  %v2807_v39 = vpop.f32.mrb[2].mxu0  ;;  %v1891_v21 = vld [vmem:[%s3387_s4 + $0x1b0] sm:$0xff]  ;;  %v1892_v22 = vld [vmem:[%s3387_s4 + $0x1b8] sm:$0xff]  ;;  %v2247_v26 = vpack.c.bf16 %v1874_v18, %v1873_v17 }
  0xf9   : > { %v2809_v40 = vpop.f32.mrb[3].mxu0  ;;  %v2249_v27 = vpack.c.bf16 %v1892_v22, %v1891_v21  ;;  %v1929_v21 = vld [vmem:[%s3387_s4 + $0x228] sm:$0xff]  ;;  %v1946_v22 = vld [vmem:[%s3387_s4 + $0x2b0] sm:$0xff] }
  0xfa   : > { %578 = vmatprep.mubr.f32.mxu1 %v2775_v23  ;;  %v888_v19 = vrot.slane %v2775_v23, 4  ;;  %v1876_v23 = vld [vmem:[%s3387_s4 + $0x138] sm:$0xff] }
  0xfb   : > { %579 = vmatmul.mubr.f32.vlgmr.msra.gmra.mrb[0].mxu1 %v2777_v25  ;;  %v2251_v31 = vpack.c.bf16 %v1876_v23, %v1875_v28  ;;  %v1930_v23 = vld [vmem:[%s3387_s4 + $0x230] sm:$0xff] }
  0xfc   : > { %1046 = vmatprep.mubr.f32.mxu1 %v2506_v1  ;;  %2272 = vmatpush1.bf16.msra.mxu1 %v2271_v48  ;;  %v1882_v48 = vld [vmem:[%s3387_s4 + $0x168] sm:$0xff] }
  0xfd   : > { %2274 = vmatprep.subr.bf16.mxu1 %v2273_v52  ;;  %v2263_v51 = vpack.c.bf16 %v1882_v48, %v1881_v47  ;;  %v2265_v52 = vpack.c.bf16 %v1900_v50, %v1899_v49  ;;  %v1936_v48 = vld [vmem:[%s3387_s4 + $0x260] sm:$0xff]  ;;  %v1937_v49 = vld [vmem:[%s3387_s4 + $0x268] sm:$0xff]  ;;  %v1954_v50 = vld [vmem:[%s3387_s4 + $0x2f0] sm:$0xff] }
 0x100   : > { %2276 = vmatpush1.bf16.msra.mxu1 %v2275_v56  ;;  %v887_v56 = vrot.slane %v2777_v25, 4  ;;  %v1915_v25 = vld [vmem:[%s3388_s5 + $0xf0] sm:$0xff] }
 0x101   : > { %2278 = vmatprep.subr.bf16.mxu1 %v2277_v57  ;;  %v1914_v57 = vld [vmem:[%s3388_s5 + $0xe8] sm:$0xff] }
 0x102   : > { %v2281_v59 = vpack.c.bf16 %v1916_v58, %v1914_v57  ;;  %v1996_v57 = vld [vmem:[%s3387_s4 + $0x388] sm:$0xff] }
 0x104   : > { %2280 = vmatpush1.bf16.msra.mxu1 %v2279_v60  ;;  %v1913_v60 = vld [vmem:[%s3388_s5 + $0xe0] sm:$0xff] }
 0x105   : > { %v2283_v61 = vpack.c.bf16 %v1915_v25, %v1913_v60  ;;  %2282 = vmatprep.subr.bf16.mxu1 %v2281_v59  ;;  %v1979_v25 = vld [vmem:[%s3387_s4 + $0x300] sm:$0xff] }
 0x108   : > { %2284 = vmatpush1.bf16.msra.mxu1 %v2283_v61  ;;  %v1980_v61 = vld [vmem:[%s3387_s4 + $0x308] sm:$0xff] }
 0x1ce   : > { %v2073_v35 = vpop.f32.mrb[0].mxu1 }
 0x1cf   : > { %v2074_v36 = vpop.f32.mrb[1].mxu1 }
 0x1d0   : > { %v2075_v37 = vadd.f32 %v2074_v36, %v2073_v35  ;;  %v1895_v35 = vld [vmem:[%s3387_s4 + $0x1d0] sm:$0xff]  ;;  %v1896_v36 = vld [vmem:[%s3387_s4 + $0x1d8] sm:$0xff] }
 0x1d2   : > { %v584_v38 = vmax.f32 %v2075_v37, 0.0  ;;  %v2255_v37 = vpack.c.bf16 %v1878_v34, %v1877_v33  ;;  %v1932_v34 = vld [vmem:[%s3387_s4 + $0x240] sm:$0xff] }
 0x1d4   : > { %1862 = vmatmul.mubr.msk.f32.vlgmr.msra.gmra.mrb[4].mxu0 %vm601_vm1, %v584_v38  ;;  %v2257_v38 = vpack.c.bf16 %v1896_v36, %v1895_v35  ;;  %v1933_v35 = vld [vmem:[%s3387_s4 + $0x248] sm:$0xff]  ;;  %v1950_v36 = vld [vmem:[%s3387_s4 + $0x2d0] sm:$0xff] }
 0x1d5   : > { %756 = vmatprep.mubr.f32.mxu0 %v2506_v1 }
 0x2a7   : > { %v671_v63 = vpop.f32.mrb[4].mxu0 }
 0x2a8   : > { %v673_v0 = vpop.f32.mrb[5].mxu0 }
 0x2a9   : > { %1863 = vmatprep.subr.msk.mxu0 %vm685_vm2, %v673_v0 }
 0x2aa   : > { %1864 = vmatpush1.msk.msra.mxu0 %vm685_vm2, %v671_v63  ;;  %v1941_v63 = vld [vmem:[%s3387_s4 + $0x288] sm:$0xff] }
 0x2ab   : > { %1865 = vmatmul.mubr.msk.f32.vlgmr.msra.gmra.mrb[6].mxu0 %vm678_vm3, %v676_v2  ;;  %2234 = vmatprep.subr.bf16.mxu0 %v2656_v20  ;;  %v1887_v20 = vld [vmem:[%s3387_s4 + $0x190] sm:$0xff]  ;;  %v2285_v0 = vpack.c.bf16 %v1941_v63, %v1940_v62  ;;  %v2993_v2 = vpop.permute.xlu1 %457  ;;  %v1998_v63 = vld [vmem:[%s3387_s4 + $0x398] sm:$0xff] }
 0x2ac   : > { %762 = vmatprep.mubr.f32.mxu0 %v2506_v1  ;;  %2236 = vmatpush1.bf16.msra.mxu0 %v2661_v24  ;;  %v1888_v24 = vld [vmem:[%s3387_s4 + $0x198] sm:$0xff]  ;;  %v463_v6 = vmul.f32 %v2993_v2, %v2809_v40  ;;  %v462_v59 = vmul.f32 %v2993_v2, %v2807_v39  ;;  %v1997_v62 = vld [vmem:[%s3387_s4 + $0x390] sm:$0xff]  ;;  %v2335_v39 = vpack.c.bf16 %v1980_v61, %v1979_v25 }
 0x2ad   : > { %2238 = vmatprep.subr.bf16.mxu0 %v2237_v3  ;;  %v2241_v9 = vpack.c.bf16 %v1888_v24, %v1887_v20  ;;  %2286 = vmatprep.subr.bf16.mxu1 %v2285_v0  ;;  %v1942_v24 = vld [vmem:[%s3387_s4 + $0x290] sm:$0xff]  ;;  %v1927_v40 = vld [vmem:[%s3387_s4 + $0x218] sm:$0xff]  ;;  %v2337_v2 = vpack.c.bf16 %v1998_v63, %v1997_v62 }
 0x2ae   : > { %v2291_v17 = vpack.c.bf16 %v1927_v40, %v1926_v13  ;;  %v1985_v40 = vld [vmem:[%s3387_s4 + $0x330] sm:$0xff]  ;;  %v1967_v25 = vld [vmem:[%s3388_s5 + $0x158] sm:$0xff] }
 0x2af   : > { %1866 = vmatmul.mubr.msk.f32.gmra.mrb[8].mxu0 %vm678_vm3, %v677_v4  ;;  %v1924_v4 = vld [vmem:[%s3387_s4 + $0x200] sm:$0xff]  ;;  %v1919_v62 = vld [vmem:[%s3390_s7 + $0x18] sm:$0xff] }
 0x2b0   : > { %839 = vmatprep.mubr.f32.mxu0 %v2506_v1  ;;  %v2287_v10 = vpack.c.bf16 %v1925_v5, %v1924_v4  ;;  %v1982_v4 = vld [vmem:[%s3387_s4 + $0x318] sm:$0xff] }
 0x2b3   : > { %1867 = vmatmul.mubr.msk.f32.vlgmr.msra.gmra.mrb[6].mxu0 %vm364_vm0, %v480_v7  ;;  %v1943_v7 = vld [vmem:[%s3387_s4 + $0x298] sm:$0xff] }
 0x2b4   : > { %2240 = vmatpush3.bf16.msra.mxu0 %v2239_v8  ;;  %845 = vmatprep.mubr.f32.mxu0 %v2506_v1  ;;  %v3009_v8 = vpop.permute.xlu1 %473  ;;  %v2289_v12 = vpack.c.bf16 %v1943_v7, %v1942_v24 }
 0x2b5   : > { %2242 = vmatprep.subr.bf16.mxu0 %v2241_v9  ;;  %v478_v0 = vadd.f32 %v3009_v8, %v462_v59  ;;  %v1962_v59 = vld [vmem:[%s3388_s5 + $0x130] sm:$0xff] }
 0x2b7   : > { %1868 = vmatmul.mubr.msk.f32.gmra.mrb[8].mxu0 %vm364_vm0, %v481_v14  ;;  %v3018_v14 = vadd.f32 %v3009_v8, %v463_v6  ;;  %v1999_v6 = vld [vmem:[%s3387_s4 + $0x3a0] sm:$0xff] }
 0x2b8   : > { %2244 = vmatpush3.bf16.msra.mxu0 %v2243_v15  ;;  %955 = vmatprep.mubr.f32.mxu0 %v888_v19  ;;  %v1944_v15 = vld [vmem:[%s3387_s4 + $0x2a0] sm:$0xff] }
 0x2b9   : > { %2246 = vmatprep.subr.bf16.mxu0 %v2245_v16  ;;  %v1945_v16 = vld [vmem:[%s3387_s4 + $0x2a8] sm:$0xff]  ;;  %v1928_v19 = vld [vmem:[%s3387_s4 + $0x220] sm:$0xff]  ;;  %v1476_v5 = vrot.slane %v3018_v14, 4 }
 0x2ba   : > { %v2293_v18 = vpack.c.bf16 %v1945_v16, %v1944_v15  ;;  %v1983_v8 = vld [vmem:[%s3387_s4 + $0x320] sm:$0xff]  ;;  %v2004_v16 = vld [vmem:[%s3387_s4 + $0x3c8] sm:$0xff] }
 0x2bb   : > { %v2003_v15 = vld [vmem:[%s3387_s4 + $0x3c0] sm:$0xff] }
 0x2bc   : > { %2248 = vmatpush3.bf16.msra.mxu0 %v2247_v26  ;;  %v1947_v26 = vld [vmem:[%s3387_s4 + $0x2b8] sm:$0xff] }
 0x2bd   : > { %2250 = vmatprep.subr.bf16.mxu0 %v2249_v27  ;;  %v2295_v27 = vpack.c.bf16 %v1929_v21, %v1928_v19  ;;  %v2297_v28 = vpack.c.bf16 %v1947_v26, %v1946_v22  ;;  %v1987_v19 = vld [vmem:[%s3387_s4 + $0x340] sm:$0xff]  ;;  %v1988_v21 = vld [vmem:[%s3387_s4 + $0x348] sm:$0xff]  ;;  %v2005_v22 = vld [vmem:[%s3387_s4 + $0x3d0] sm:$0xff] }
 0x2be   : > { %v2006_v26 = vld [vmem:[%s3387_s4 + $0x3d8] sm:$0xff] }
 0x2c0   : > { %2252 = vmatpush3.bf16.msra.mxu0 %v2251_v31  ;;  %v1949_v31 = vld [vmem:[%s3387_s4 + $0x2c8] sm:$0xff] }
 0x2c1   : > { %2254 = vmatprep.subr.bf16.mxu0 %v2253_v32  ;;  %v2299_v32 = vpack.c.bf16 %v1931_v29, %v1930_v23  ;;  %v2301_v33 = vpack.c.bf16 %v1949_v31, %v1948_v30  ;;  %v1989_v23 = vld [vmem:[%s3387_s4 + $0x350] sm:$0xff]  ;;  %v1990_v29 = vld [vmem:[%s3387_s4 + $0x358] sm:$0xff]  ;;  %v2007_v30 = vld [vmem:[%s3387_s4 + $0x3e0] sm:$0xff] }
 0x2c2   : > { %v2008_v31 = vld [vmem:[%s3387_s4 + $0x3e8] sm:$0xff] }
 0x2c4   : > { %2256 = vmatpush3.bf16.msra.mxu0 %v2255_v37  ;;  %v1951_v37 = vld [vmem:[%s3387_s4 + $0x2d8] sm:$0xff] }
 0x2c5   : > { %2258 = vmatprep.subr.bf16.mxu0 %v2257_v38  ;;  %v2303_v38 = vpack.c.bf16 %v1933_v35, %v1932_v34  ;;  %v2305_v41 = vpack.c.bf16 %v1951_v37, %v1950_v36  ;;  %v1991_v34 = vld [vmem:[%s3387_s4 + $0x360] sm:$0xff]  ;;  %v1992_v35 = vld [vmem:[%s3387_s4 + $0x368] sm:$0xff]  ;;  %v2009_v36 = vld [vmem:[%s3387_s4 + $0x3f0] sm:$0xff] }
 0x2c6   : > { %v2010_v37 = vld [vmem:[%s3387_s4 + $0x3f8] sm:$0xff] }
 0x2c8   : > { %2260 = vmatpush3.bf16.msra.mxu0 %v2259_v45  ;;  %v1953_v45 = vld [vmem:[%s3387_s4 + $0x2e8] sm:$0xff] }
 0x2c9   : > { %2262 = vmatprep.subr.bf16.mxu0 %v2261_v46  ;;  %v2307_v46 = vpack.c.bf16 %v1935_v43, %v1934_v42  ;;  %v2309_v47 = vpack.c.bf16 %v1953_v45, %v1952_v44  ;;  %v1993_v42 = vld [vmem:[%s3387_s4 + $0x370] sm:$0xff]  ;;  %v1994_v43 = vld [vmem:[%s3387_s4 + $0x378] sm:$0xff]  ;;  %v1475_v45 = vrot.slane %v478_v0, 4 }
 0x2ca   : > { %v2363_v44 = vpack.c.bf16 %v1994_v43, %v1993_v42  ;;  %v2023_v43 = vld [vmem:[%s3388_s5 + $0x1e0] sm:$0xff] }
 0x2cc   : > { %2264 = vmatpush3.bf16.msra.mxu0 %v2263_v51  ;;  %v1955_v51 = vld [vmem:[%s3387_s4 + $0x2f8] sm:$0xff] }
 0x2cd   : > { %2266 = vmatprep.subr.bf16.mxu0 %v2265_v52  ;;  %v2311_v52 = vpack.c.bf16 %v1937_v49, %v1936_v48  ;;  %v2313_v53 = vpack.c.bf16 %v1955_v51, %v1954_v50  ;;  %v1956_v48 = vld [vmem:[%s3388_s5 + $0x100] sm:$0xff]  ;;  %v1958_v49 = vld [vmem:[%s3388_s5 + $0x110] sm:$0xff]  ;;  %v1961_v50 = vld [vmem:[%s3388_s5 + $0x128] sm:$0xff] }
 0x2ce   : > { %v1963_v51 = vld [vmem:[%s3388_s5 + $0x138] sm:$0xff] }
 0x2d0   : > { %2268 = vmatpush3.bf16.msra.mxu0 %v2267_v55  ;;  %v1939_v55 = vld [vmem:[%s3387_s4 + $0x278] sm:$0xff] }
 0x2d1   : > { %v2315_v58 = vpack.c.bf16 %v1939_v55, %v1938_v54  ;;  %v1918_v55 = vld [vmem:[%s3390_s7 + $0x10] sm:$0xff] }
 0x2d3   : > { %956 = vmatmul.mubr.f32.vlgmr.msra.gmra.mrb[10].mxu0 %v887_v56  ;;  %v1995_v56 = vld [vmem:[%s3387_s4 + $0x380] sm:$0xff] }
 0x2d4   : > { %1132 = vmatprep.mubr.f32.mxu0 %v2506_v1  ;;  %v2333_v60 = vpack.c.bf16 %v1996_v57, %v1995_v56  ;;  %v2319_v56 = vpack.c.bf16 %v1958_v49, %v1956_v48  ;;  %v2321_v57 = vpack.c.bf16 %v1963_v51, %v1961_v50  ;;  %v2028_v49 = vld [vmem:[%s3390_s7 + $0x30] sm:$0xff]  ;;  %v2029_v50 = vld [vmem:[%s3390_s7 + $0x38] sm:$0xff]  ;;  %v1742_v51 = vpop.permute.xlu0 %1741 }
 0x3a6   : > { %v2108_v3 = vpop.f32.mrb[10].mxu0 }
 0x3a7   : > { %v2109_v20 = vpop.f32.mrb[11].mxu0 }
 0x3a8   : > { %v2110_v9 = vadd.f32 %v2109_v20, %v2108_v3  ;;  %v1981_v3 = vld [vmem:[%s3387_s4 + $0x310] sm:$0xff]  ;;  %v2000_v20 = vld [vmem:[%s3387_s4 + $0x3a8] sm:$0xff] }
 0x3a9   : > { %v2339_v24 = vpack.c.bf16 %v1982_v4, %v1981_v3  ;;  %v2341_v7 = vpack.c.bf16 %v2000_v20, %v1999_v6  ;;  %v1971_v3 = vld [vmem:[%s3388_s5 + $0x178] sm:$0xff]  ;;  %v1968_v6 = vld [vmem:[%s3388_s5 + $0x160] sm:$0xff]  ;;  %v1970_v20 = vld [vmem:[%s3388_s5 + $0x170] sm:$0xff] }
 0x3aa   : > { %v961_v11 = vmax.f32 %v2110_v9, 0.0  ;;  %v1984_v9 = vld [vmem:[%s3387_s4 + $0x328] sm:$0xff] }
 0x3ac   : > { %1917 = vmatmul.mubr.msk.f32.vlgmr.msra.gmra.mrb[2].mxu1 %vm601_vm1, %v961_v11  ;;  %v2002_v11 = vld [vmem:[%s3387_s4 + $0x3b8] sm:$0xff] }
 0x3ad   : > { %2288 = vmatpush3.bf16.msra.mxu1 %v2287_v10  ;;  %1246 = vmatprep.mubr.f32.mxu1 %v3018_v14  ;;  %v2001_v10 = vld [vmem:[%s3387_s4 + $0x3b0] sm:$0xff]  ;;  %v1986_v14 = vld [vmem:[%s3387_s4 + $0x338] sm:$0xff] }
 0x3ae   : > { %2290 = vmatprep.subr.bf16.mxu1 %v2289_v12  ;;  %v2343_v12 = vpack.c.bf16 %v1984_v9, %v1983_v8  ;;  %v2345_v13 = vpack.c.bf16 %v2002_v11, %v2001_v10 }
 0x3b1   : > { %2292 = vmatpush3.bf16.msra.mxu1 %v2291_v17  ;;  %v2347_v17 = vpack.c.bf16 %v1986_v14, %v1985_v40  ;;  %v2012_v40 = vld [vmem:[%s3388_s5 + $0x188] sm:$0xff]  ;;  %v2014_v14 = vld [vmem:[%s3388_s5 + $0x198] sm:$0xff] }
 0x3b2   : > { %2294 = vmatprep.subr.bf16.mxu1 %v2293_v18  ;;  %v2349_v18 = vpack.c.bf16 %v2004_v16, %v2003_v15  ;;  %v2011_v15 = vld [vmem:[%s3388_s5 + $0x180] sm:$0xff]  ;;  %v2013_v16 = vld [vmem:[%s3388_s5 + $0x190] sm:$0xff] }
 0x3b5   : > { %2296 = vmatpush3.bf16.msra.mxu1 %v2295_v27  ;;  %v2351_v27 = vpack.c.bf16 %v1988_v21, %v1987_v19  ;;  %v2365_v21 = vpack.c.bf16 %v2014_v14, %v2012_v40 }
 0x3b6   : > { %2298 = vmatprep.subr.bf16.mxu1 %v2297_v28  ;;  %v2353_v28 = vpack.c.bf16 %v2006_v26, %v2005_v22  ;;  %v1973_v26 = vld [vmem:[%s3390_s7 + $0x20] sm:$0xff] }
 0x3b9   : > { %2300 = vmatpush3.bf16.msra.mxu1 %v2299_v32  ;;  %v2355_v32 = vpack.c.bf16 %v1990_v29, %v1989_v23  ;;  %v2015_v23 = vld [vmem:[%s3388_s5 + $0x1a0] sm:$0xff]  ;;  %v2017_v29 = vld [vmem:[%s3388_s5 + $0x1b0] sm:$0xff] }
 0x3ba   : > { %2302 = vmatprep.subr.bf16.mxu1 %v2301_v33  ;;  %v2357_v33 = vpack.c.bf16 %v2008_v31, %v2007_v30  ;;  %v2020_v30 = vld [vmem:[%s3388_s5 + $0x1c8] sm:$0xff]  ;;  %v2022_v31 = vld [vmem:[%s3388_s5 + $0x1d8] sm:$0xff] }
 0x3bd   : > { %2304 = vmatpush3.bf16.msra.mxu1 %v2303_v38  ;;  %v2359_v38 = vpack.c.bf16 %v1992_v35, %v1991_v34  ;;  %v2373_v34 = vpack.c.bf16 %v2022_v31, %v2020_v30  ;;  %v2019_v35 = vld [vmem:[%s3388_s5 + $0x1c0] sm:$0xff] }
 0x3be   : > { %2306 = vmatprep.subr.bf16.mxu1 %v2305_v41  ;;  %v2361_v41 = vpack.c.bf16 %v2010_v37, %v2009_v36  ;;  %v2021_v36 = vld [vmem:[%s3388_s5 + $0x1d0] sm:$0xff]  ;;  %v2024_v37 = vld [vmem:[%s3388_s5 + $0x1e8] sm:$0xff] }
 0x3c1   : > { %2308 = vmatpush3.bf16.msra.mxu1 %v2307_v46  ;;  %v1957_v46 = vld [vmem:[%s3388_s5 + $0x108] sm:$0xff] }
 0x3c2   : > { %2310 = vmatprep.subr.bf16.mxu1 %v2309_v47  ;;  %v1959_v47 = vld [vmem:[%s3388_s5 + $0x118] sm:$0xff] }
 0x3c5   : > { %2312 = vmatpush3.bf16.msra.mxu1 %v2311_v52 }
 0x3c6   : > { %2314 = vmatprep.subr.bf16.mxu1 %v2313_v53  ;;  %v2317_v53 = vpack.c.bf16 %v1959_v47, %v1957_v46 }
 0x3c9   : > { %2316 = vmatpush3.bf16.msra.mxu1 %v2315_v58  ;;  %v1960_v58 = vld [vmem:[%s3388_s5 + $0x120] sm:$0xff] }
 0x3ca   : > { %2334 = vmatprep.subr.bf16.mxu1 %v2333_v60  ;;  %v1965_v60 = vld [vmem:[%s3388_s5 + $0x148] sm:$0xff]  ;;  %v2323_v61 = vpack.c.bf16 %v1962_v59, %v1960_v58 }
 0x3cb   : > { %v2325_v63 = vpack.c.bf16 %v1967_v25, %v1965_v60 }
 0x3cc   : > { %1247 = vmatmul.mubr.f32.vlgmr.msra.gmra.mrb[4].mxu1 %v478_v0  ;;  %v1966_v0 = vld [vmem:[%s3388_s5 + $0x150] sm:$0xff] }
 0x3cd   : > { %2336 = vmatpush3.bf16.msra.mxu1 %v2335_v39  ;;  %1543 = vmatprep.mubr.f32.mxu1 %v1476_v5  ;;  %v1964_v39 = vld [vmem:[%s3388_s5 + $0x140] sm:$0xff] }
 0x3ce   : > { %2338 = vmatprep.subr.bf16.mxu1 %v2337_v2  ;;  %v1969_v2 = vld [vmem:[%s3388_s5 + $0x168] sm:$0xff]  ;;  %v2327_v4 = vpack.c.bf16 %v1966_v0, %v1964_v39 }
 0x3cf   : > { %v2329_v5 = vpack.c.bf16 %v1971_v3, %v1969_v2 }
 0x3d1   : > { %2340 = vmatpush3.bf16.msra.mxu1 %v2339_v24  ;;  %v2331_v24 = vpack.c.bf16 %v1970_v20, %v1968_v6 }
 0x3d2   : > { %2342 = vmatprep.subr.bf16.mxu1 %v2341_v7 }
 0x3d5   : > { %2344 = vmatpush3.bf16.msra.mxu1 %v2343_v12 }
 0x3d6   : > { %2346 = vmatprep.subr.bf16.mxu1 %v2345_v13 }
 0x3d9   : > { %2348 = vmatpush3.bf16.msra.mxu1 %v2347_v17  ;;  %v2016_v17 = vld [vmem:[%s3388_s5 + $0x1a8] sm:$0xff] }
 0x3da   : > { %2350 = vmatprep.subr.bf16.mxu1 %v2349_v18  ;;  %v2018_v18 = vld [vmem:[%s3388_s5 + $0x1b8] sm:$0xff] }
 0x3dd   : > { %2352 = vmatpush3.bf16.msra.mxu1 %v2351_v27  ;;  %v2367_v27 = vpack.c.bf16 %v2013_v16, %v2011_v15 }
 0x3de   : > { %2354 = vmatprep.subr.bf16.mxu1 %v2353_v28  ;;  %v2369_v28 = vpack.c.bf16 %v2018_v18, %v2016_v17 }
 0x3e1   : > { %2356 = vmatpush3.bf16.msra.mxu1 %v2355_v32  ;;  %v2371_v32 = vpack.c.bf16 %v2017_v29, %v2015_v23 }
 0x3e2   : > { %2358 = vmatprep.subr.bf16.mxu1 %v2357_v33  ;;  %v1974_v33 = vld [vmem:[%s3390_s7 + $0x28] sm:$0xff] }
 0x3e5   : > { %2360 = vmatpush3.bf16.msra.mxu1 %v2359_v38  ;;  %v2026_v38 = vld [vmem:[%s3388_s5 + $0x1f8] sm:$0xff] }
 0x3e6   : > { %2362 = vmatprep.subr.bf16.mxu1 %v2361_v41  ;;  %v2375_v41 = vpack.c.bf16 %v2021_v36, %v2019_v35  ;;  %v2377_v42 = vpack.c.bf16 %v2026_v38, %v2024_v37 }
 0x3e9   : > { %2364 = vmatpush3.bf16.msra.mxu1 %v2363_v44  ;;  %v2025_v44 = vld [vmem:[%s3388_s5 + $0x1f0] sm:$0xff] }
 0x3ec   : > { %1544 = vmatmul.mubr.f32.vlgmr.msra.gmra.mrb[6].mxu1 %v1475_v45  ;;  %v2379_v45 = vpack.c.bf16 %v2025_v44, %v2023_v43 }
 0x47f   : > { %v1048_v52 = vpop.f32.mrb[2].mxu1 }
 0x480   : > { %v1050_v54 = vpop.f32.mrb[3].mxu1 }
 0x481   : > { %1920 = vmatprep.subr.msk.mxu0 %vm685_vm2, %v1050_v54 }
 0x482   : > { %1921 = vmatpush1.msk.msra.mxu0 %vm685_vm2, %v1048_v52  ;;  %v1747_v52 = vpop.permute.xlu1 %1746 }
 0x483   : > { %2318 = vmatprep.subr.bf16.mxu0 %v2317_v53  ;;  %1922 = vmatmul.mubr.msk.f32.vlgmr.msra.gmra.mrb[6].mxu0 %vm678_vm3, %v1918_v55 }
 0x484   : > { %2320 = vmatpush1.bf16.msra.mxu0 %v2319_v56  ;;  %1138 = vmatprep.mubr.f32.mxu0 %v2506_v1  ;;  %v1758_v56 = vpop.permute.xlu0 %1757 }
 0x485   : > { %2322 = vmatprep.subr.bf16.mxu0 %v2321_v57 }
 0x487   : > { %1923 = vmatmul.mubr.msk.f32.gmra.mrb[8].mxu0 %vm678_vm3, %v1919_v62  ;;  %v1763_v62 = vpop.permute.xlu1 %1762 }
 0x488   : > { %2324 = vmatpush1.bf16.msra.mxu0 %v2323_v61  ;;  %1337 = vmatprep.mubr.f32.mxu0 %v2506_v1 }
 0x489   : > { %2326 = vmatprep.subr.bf16.mxu0 %v2325_v63 }
 0x48c   : > { %2328 = vmatpush1.bf16.msra.mxu0 %v2327_v4 }
 0x48d   : > { %2330 = vmatprep.subr.bf16.mxu0 %v2329_v5 }
 0x490   : > { %2332 = vmatpush1.bf16.msra.mxu0 %v2331_v24 }
 0x49f   : > { %v2143_v7 = vpop.f32.mrb[4].mxu1 }
 0x4a0   : > { %v2144_v8 = vpop.f32.mrb[5].mxu1 }
 0x4a1   : > { %v2145_v9 = vadd.f32 %v2144_v8, %v2143_v7 }
 0x4a3   : > { %v1252_v10 = vmax.f32 %v2145_v9, 0.0 }
 0x4a5   : > { %1972 = vmatmul.mubr.msk.f32.vlgmr.msra.gmra.mrb[12].mxu0 %vm601_vm1, %v1252_v10 }
 0x4a6   : > { %1423 = vmatprep.mubr.f32.mxu0 %v2506_v1 }
 0x4bf   : > { %v2178_v11 = vpop.f32.mrb[6].mxu1 }
 0x4c0   : > { %v2179_v12 = vpop.f32.mrb[7].mxu1 }
 0x4c1   : > { %v2180_v13 = vadd.f32 %v2179_v12, %v2178_v11 }
 0x4c3   : > { %v1549_v46 = vmax.f32 %v2180_v13, 0.0 }
 0x578   : > { %v1339_v19 = vpop.f32.mrb[12].mxu0 }
 0x579   : > { %v1341_v22 = vpop.f32.mrb[13].mxu0 }
 0x57a   : > { %1975 = vmatprep.subr.msk.mxu0 %vm685_vm2, %v1341_v22 }
 0x57b   : > { %1976 = vmatpush1.msk.msra.mxu0 %vm685_vm2, %v1339_v19 }
 0x57c   : > { %2366 = vmatprep.subr.bf16.mxu0 %v2365_v21  ;;  %1977 = vmatmul.mubr.msk.f32.vlgmr.msra.gmra.mrb[6].mxu0 %vm678_vm3, %v1973_v26 }
 0x57d   : > { %2368 = vmatpush1.bf16.msra.mxu0 %v2367_v27  ;;  %1429 = vmatprep.mubr.f32.mxu0 %v2506_v1 }
 0x57e   : > { %2370 = vmatprep.subr.bf16.mxu0 %v2369_v28 }
 0x580   : > { %1978 = vmatmul.mubr.msk.f32.gmra.mrb[8].mxu0 %vm678_vm3, %v1974_v33 }
 0x581   : > { %2372 = vmatpush1.bf16.msra.mxu0 %v2371_v32  ;;  %1634 = vmatprep.mubr.f32.mxu0 %v2506_v1 }
 0x582   : > { %2374 = vmatprep.subr.bf16.mxu0 %v2373_v34 }
 0x585   : > { %2376 = vmatpush1.bf16.msra.mxu0 %v2375_v41 }
 0x586   : > { %2378 = vmatprep.subr.bf16.mxu0 %v2377_v42 }
 0x589   : > { %2380 = vmatpush1.bf16.msra.mxu0 %v2379_v45 }
 0x58c   : > { %2027 = vmatmul.mubr.msk.f32.vlgmr.msra.gmra.mrb[14].mxu0 %vm601_vm1, %v1549_v46 }
 0x58d   : > { %1720 = vmatprep.mubr.f32.mxu0 %v2506_v1 }
 0x65f   : > { %v1636_v47 = vpop.f32.mrb[14].mxu0 }
 0x660   : > { %v1638_v48 = vpop.f32.mrb[15].mxu0 }
 0x661   : > { %2030 = vmatprep.subr.msk.mxu0 %vm685_vm2, %v1638_v48 }
 0x662   : > { %2031 = vmatpush1.msk.msra.mxu0 %vm685_vm2, %v1636_v47 }
 0x663   : > { %2032 = vmatmul.mubr.msk.f32.vlgmr.msra.gmra.mrb[6].mxu0 %vm678_vm3, %v2028_v49 }
 0x664   : > { %1726 = vmatprep.mubr.f32.mxu0 %v2506_v1 }
 0x667   : > { %2033 = vmatmul.mubr.msk.f32.gmra.mrb[8].mxu0 %vm678_vm3, %v2029_v50 }
 0x736   : > { %v1722_v53 = vpop.f32.mrb[6].mxu0 }
 0x737   : > { %v1749_v54 = vmul.f32 %v1742_v51, %v1722_v53  ;;  %v1724_v55 = vpop.f32.mrb[7].mxu0 }
 0x738   : > { %v1750_v57 = vmul.f32 %v1742_v51, %v1724_v55 }
 0x739   : > { %v1765_v58 = vadd.f32 %v1758_v56, %v1749_v54 }
 0x73a   : > { %v1766_v59 = vadd.f32 %v1758_v56, %v1750_v57  ;;  %v1728_v1 = vpop.f32.mrb[8].mxu0 }
 0x73b   : > { %v1769_v60 = vmax.f32 %v1765_v58, 0.0  ;;  %v1751_v25 = vmul.f32 %v1747_v52, %v1728_v1  ;;  %v1730_v61 = vpop.f32.mrb[9].mxu0 }
 0x73c   : > { %v1770_v63 = vmax.f32 %v1766_v59, 0.0  ;;  %v1752_v39 = vmul.f32 %v1747_v52, %v1730_v61 }
 0x73d   : > { %1773 = vst [vmem:[%s352_s30] sm:$0xff] %v1769_v60  ;;  %v1767_v0 = vadd.f32 %v1763_v62, %v1751_v25 }
 0x73e   : > { %1774 = vst [vmem:[%s352_s30 + $0x8] sm:$0xff] %v1770_v63  ;;  %v1768_v2 = vadd.f32 %v1763_v62, %v1752_v39 }
 0x73f   : > { %v1771_v3 = vmax.f32 %v1767_v0, 0.0 }
 0x740   : > { %v1772_v4 = vmax.f32 %v1768_v2, 0.0 }
 0x741   : > { %1775 = vst [vmem:[%s352_s30 + $0x10] sm:$0xff] %v1771_v3 }
 0x742   : > { %1776 = vst [vmem:[%s352_s30 + $0x18] sm:$0xff] %v1772_v4 }
 0x743   : > { %2455 = shalt.err (!%p2452_p3)
}
 0x744   : > { %s2456_s27 = scalar_lea.hbm %s3338_s18, 512  ;;  %s2460_s30 = scalar_lea.hbm %s3393_s10, 1024 }
 0x745   : > { %p2457_p4 = scmp.ne.s32.totalorder %s3338_s18, %s2456_s27  ;;  %p2461_p9 = scmp.lt.u32.totalorder %s3338_s18, %s3393_s10 }
 0x746   : > { %p2462_p10 = scmp.lt.u32.totalorder %s2460_s30, %s2456_s27  ;;  %p2464_p12 = scmp.lt.u32.totalorder %s2456_s27, %s3338_s18 }
 0x747   : > { %p2458_p7 = pnand %p2457_p4, %p2604_p5 }
 0x748   : > { %p2463_p11 = por %p2462_p10, %p2461_p9 }
 0x749   : > { %p2459_p8 = pneg %p2458_p7 }
 0x74a   : > { %p2465_p13 = por %p2464_p12, %p2463_p11 }
 0x74c   : > { %p2466_p0 = pnand %p2465_p13, %p2459_p8 }
 0x74e   : > { %2469 = shalt.err (!%p2466_p0)
}
 0x74f   : > { %s2509_s12 = smov 256   ;;  %s2510_s20 = smov 16  }
 0x750   : > { %2397 = dma.vmem_to_hbm [thread:$0]  (%p2604_p5), %s3333_s22, 512, %s3338_s18, %s3342_s17, %s2509_s12, %s2509_s12, %s2510_s20  }
 0x751 PF: > { %p2403_p1 = scmp.ge.s32.totalorder %s2504_s16, 2  ;;  %s1806_s21 = sand.u32 1, %s2492_s13  }
 0x752   : > { %s1807_s25 = scalar_lea.sflag [#allocation3], %s1806_s21 }
 0x753   : > { %p2400_p2 = pnand %p2403_p1, %p2608_p6 }
 0x755   : > { %2487 = dma.done.wait (!%p2400_p2), %s1807_s25, 512  }
 0x756   : > { %2489 = vsyncadd (!%p2400_p2), %s1807_s25, 4294966784  ;;  %s3399_s26 = sld [smem:[#allocation5_spill]]  ;;  %s3400_s15 = sld [smem:[#allocation6_spill]] }
 0x757   : > { %p20_p3 = scmp.ge.s32.totalorder %s2591_s19, 4   ;;  %s3401_s13 = smov %s2496_s14 }
 0x758   : > { %s3403_s16 = smov %s2591_s19 }
 0x759   :  { %22 = sbr.rel (!%p20_p3) target bundleno = 3 (0x3), region = 104 }
 0x75c   : > { %s3402_s14 = smov %s3399_s26 }
 0x760   :  { %1812 = vsyncpa [#allocation3], 1 }
 0x761   :  { %1814 = vsyncpa [#allocation3 + $0x1], 1 }

</bundles_post_ra>
